<compile_context>
chip_gen: v7x
topology: tpu7x:2x2x1
jax: 0.10.0
libtpu: 0.0.40
codegen_flags: <defaults>
</compile_context>

<pallas_src>
import jax
import jax.numpy as jnp
from jax.experimental import pallas as pl
from jax.experimental.pallas import tpu as pltpu

LN_EPS = 1e-5
_MAX_BLOCK_ROWS = 1024  # rows per grid step


def _round_up(x, m):
    return (x + m - 1) // m * m


def _critic_kernel(s_ref, d_ref, c_ref,
                   w1s_ref, w1d_ref, w1c_ref, b1_ref, g1_ref, be1_ref,
                   w3_ref, b3_ref, q_ref):
    # l1 with the concat fused away:
    #   sa @ W1 == s @ W1[:S] + d @ W1[S:S+Dd] + c @ W1[S+Dd:]
    h = jnp.dot(s_ref[...], w1s_ref[...], preferred_element_type=jnp.float32)
    h = h + jnp.dot(d_ref[...], w1d_ref[...],
                    preferred_element_type=jnp.float32)
    h = h + jnp.dot(c_ref[...], w1c_ref[...],
                    preferred_element_type=jnp.float32)
    h = h + b1_ref[...]

    # LayerNorm over last dim (biased variance, eps=1e-5), affine, then ReLU.
    mean = jnp.mean(h, axis=-1, keepdims=True)
    cent = h - mean
    var = jnp.mean(cent * cent, axis=-1, keepdims=True)
    hn = cent * jax.lax.rsqrt(var + LN_EPS) * g1_ref[...] + be1_ref[...]
    a = jnp.maximum(hn, 0.0)

    # l3: one output column -> lane reduction instead of a 1-column MXU matmul.
    q_ref[...] = jnp.sum(a * w3_ref[...], axis=-1, keepdims=True) + b3_ref[...]


@jax.jit
def critic_forward(params, state, discrete_action, continuous_action):
    orig_shape = state.shape
    if state.ndim == 3:
        state = state.reshape(-1, state.shape[-1])
        discrete_action = discrete_action.reshape(-1, discrete_action.shape[-1])
        continuous_action = continuous_action.reshape(
            -1, continuous_action.shape[-1])

    state = state.astype(jnp.float32)
    discrete_action = discrete_action.astype(jnp.float32)
    continuous_action = continuous_action.astype(jnp.float32)

    N, S = state.shape
    Dd = discrete_action.shape[1]
    Dc = continuous_action.shape[1]
    H = params["w1_s"].shape[1]

    # Row block: large (amortizes per-step overhead) but capped so f32
    # double-buffered tiles stay well inside scoped VMEM on all generations.
    block = min(_MAX_BLOCK_ROWS, _round_up(N, 8))
    Np = _round_up(N, block)
    if Np != N:
        pad = Np - N
        state = jnp.pad(state, ((0, pad), (0, 0)))
        discrete_action = jnp.pad(discrete_action, ((0, pad), (0, 0)))
        continuous_action = jnp.pad(continuous_action, ((0, pad), (0, 0)))

    def row_spec(cols):
        return pl.BlockSpec((block, cols), lambda i: (i, 0))

    def const_spec(rows, cols):
        return pl.BlockSpec((rows, cols), lambda i: (0, 0))

    q = pl.pallas_call(
        _critic_kernel,
        out_shape=jax.ShapeDtypeStruct((Np, 1), jnp.float32),
        grid=(Np // block,),
        in_specs=[
            row_spec(S), row_spec(Dd), row_spec(Dc),     # activations (tiled)
            const_spec(S, H), const_spec(Dd, H), const_spec(Dc, H),  # W1 slices
            const_spec(1, H), const_spec(1, H), const_spec(1, H),    # b1, g1, be1
            const_spec(1, H), const_spec(1, 1),                      # w3 row, b3
        ],
        out_specs=pl.BlockSpec((block, 1), lambda i: (i, 0)),
        compiler_params=pltpu.CompilerParams(
            dimension_semantics=("parallel",)),
    )(state, discrete_action, continuous_action,
      params["w1_s"], params["w1_d"], params["w1_c"],
      params["b1"], params["g1"], params["be1"],
      params["w3"], params["b3"])

    q = q[:N]
    if len(orig_shape) == 3:
        q = q.reshape(orig_shape[0], orig_shape[1], 1)
    return q


def init_params(key, state_dim, num_discrete, num_continuous, hidden):
    """Deterministic init matching the module: weights/biases ~ N(0, 0.1),
    LayerNorm gamma=1, beta=0.  W1 stored pre-transposed (in, out) and split
    per input so the concat can be fused into the kernel."""
    assert hidden[0] == hidden[1], (
        "reference forward requires hidden_sizes[0] == hidden_sizes[1]")
    h = hidden[0]
    in_dim = state_dim + num_discrete + num_continuous
    k1, k2, k3, k4 = jax.random.split(key, 4)
    w1 = 0.1 * jax.random.normal(k1, (in_dim, h), jnp.float32)
    return {
        "w1_s": w1[:state_dim],                                   # (S, H)
        "w1_d": w1[state_dim:state_dim + num_discrete],           # (Dd, H)
        "w1_c": w1[state_dim + num_discrete:],                    # (Dc, H)
        "b1": 0.1 * jax.random.normal(k2, (1, h), jnp.float32),
        "g1": jnp.ones((1, h), jnp.float32),
        "be1": jnp.zeros((1, h), jnp.float32),
        "w3": 0.1 * jax.random.normal(k3, (1, h), jnp.float32),   # l3 weight row
        "b3": 0.1 * jax.random.normal(k4, (1, 1), jnp.float32),
    }


def _reference(params, state, da, ca):
    # Pure-JAX reference for correctness checking.
    sa = jnp.concatenate([state, da, ca], axis=-1).astype(jnp.float32)
    w1 = jnp.concatenate(
        [params["w1_s"], params["w1_d"], params["w1_c"]], axis=0)
    h = sa @ w1 + params["b1"]
    mean = jnp.mean(h, axis=-1, keepdims=True)
    var = jnp.mean((h - mean) ** 2, axis=-1, keepdims=True)
    hn = (h - mean) / jnp.sqrt(var + LN_EPS)
    hn = hn * params["g1"] + params["be1"]
    a = jnp.maximum(hn, 0.0)
    return a @ params["w3"].T + params["b3"]


if __name__ == "__main__":
    key = jax.random.PRNGKey(0)
    kp, ks, kd, kc, ks3, kd3, kc3 = jax.random.split(key, 7)

    # Small shapes consistent with the module.
    batch = 8
    state_dim = 12
    num_discrete = 3
    num_continuous = 2
    hidden = [32, 32]

    params = init_params(kp, state_dim, num_discrete, num_continuous, hidden)

    # --- 2-D path ---
    state = jax.random.normal(ks, (batch, state_dim), jnp.float32)
    discrete_action = jax.random.normal(kd, (batch, num_discrete), jnp.float32)
    continuous_action = jax.random.normal(kc, (batch, num_continuous),
                                          jnp.float32)

    q = critic_forward(params, state, discrete_action, continuous_action)
    q = jax.block_until_ready(q)
    q_ref = _reference(params, state, discrete_action, continuous_action)
    assert q.shape == (batch, 1), q.shape
    assert jnp.allclose(q, q_ref, atol=1e-4, rtol=1e-4), (
        f"max abs err = {jnp.max(jnp.abs(q - q_ref))}")

    # --- 3-D path (exercises flattening + ragged-row padding) ---
    B, T = 2, 5
    state3 = jax.random.normal(ks3, (B, T, state_dim), jnp.float32)
    da3 = jax.random.normal(kd3, (B, T, num_discrete), jnp.float32)
    ca3 = jax.random.normal(kc3, (B, T, num_continuous), jnp.float32)

    q3 = critic_forward(params, state3, da3, ca3)
    q3 = jax.block_until_ready(q3)
    q3_ref = _reference(
        params,
        state3.reshape(-1, state_dim),
        da3.reshape(-1, num_discrete),
        ca3.reshape(-1, num_continuous),
    ).reshape(B, T, 1)
    assert q3.shape == (B, T, 1), q3.shape
    assert jnp.allclose(q3, q3_ref, atol=1e-4, rtol=1e-4), (
        f"max abs err = {jnp.max(jnp.abs(q3 - q3_ref))}")

    print("KERNEL_OK")
</pallas_src>

<mosaic_0001>
module attributes {stable_mosaic.version = 11 : i64} {
  func.func @_critic_kernel(%arg0: i32, %arg1: memref<8x12xf32, #tpu.memory_space<vmem>>, %arg2: memref<8x3xf32, #tpu.memory_space<vmem>>, %arg3: memref<8x2xf32, #tpu.memory_space<vmem>>, %arg4: memref<12x32xf32, #tpu.memory_space<vmem>>, %arg5: memref<3x32xf32, #tpu.memory_space<vmem>>, %arg6: memref<2x32xf32, #tpu.memory_space<vmem>>, %arg7: memref<1x32xf32, #tpu.memory_space<vmem>>, %arg8: memref<1x32xf32, #tpu.memory_space<vmem>>, %arg9: memref<1x32xf32, #tpu.memory_space<vmem>>, %arg10: memref<1x32xf32, #tpu.memory_space<vmem>>, %arg11: memref<1x1xf32, #tpu.memory_space<vmem>>, %arg12: memref<8x1xf32, #tpu.memory_space<vmem>>) attributes {dimension_semantics = [#tpu.dimension_semantics<parallel>], iteration_bounds = array<i64: 1>, scalar_prefetch = 0 : i64, scratch_operands = 0 : i64, tpu.core_type = #tpu.core_type<tc>, window_params = [{transform_indices = @transform_0, window_bounds = array<i64: 8, 12>}, {transform_indices = @transform_1, window_bounds = array<i64: 8, 3>}, {transform_indices = @transform_2, window_bounds = array<i64: 8, 2>}, {pipeline_mode = #tpu.pipeline_mode<synchronous>, transform_indices = @transform_3, window_bounds = array<i64: 12, 32>}, {pipeline_mode = #tpu.pipeline_mode<synchronous>, transform_indices = @transform_4, window_bounds = array<i64: 3, 32>}, {pipeline_mode = #tpu.pipeline_mode<synchronous>, transform_indices = @transform_5, window_bounds = array<i64: 2, 32>}, {pipeline_mode = #tpu.pipeline_mode<synchronous>, transform_indices = @transform_6, window_bounds = array<i64: 1, 32>}, {pipeline_mode = #tpu.pipeline_mode<synchronous>, transform_indices = @transform_7, window_bounds = array<i64: 1, 32>}, {pipeline_mode = #tpu.pipeline_mode<synchronous>, transform_indices = @transform_8, window_bounds = array<i64: 1, 32>}, {pipeline_mode = #tpu.pipeline_mode<synchronous>, transform_indices = @transform_9, window_bounds = array<i64: 1, 32>}, {pipeline_mode = #tpu.pipeline_mode<synchronous>, transform_indices = @transform_10, window_bounds = array<i64: 1, 1>}, {transform_indices = @transform_11, window_bounds = array<i64: 8, 1>}]} {
    %c0 = arith.constant 0 : index
    %c0_0 = arith.constant 0 : index
    %0 = vector.load %arg1[%c0, %c0_0] : memref<8x12xf32, #tpu.memory_space<vmem>>, vector<8x12xf32>
    %c0_1 = arith.constant 0 : index
    %c0_2 = arith.constant 0 : index
    %1 = vector.load %arg4[%c0_1, %c0_2] : memref<12x32xf32, #tpu.memory_space<vmem>>, vector<12x32xf32>
    %cst = arith.constant dense<0.000000e+00> : vector<8x32xf32>
    %2 = tpu.matmul %0, %1, %cst {dimension_numbers = #tpu.dot_dimension_numbers<[1], [0], [0], [1], [0, 0, 1, 1], [], []>} : vector<8x12xf32>, vector<12x32xf32>, vector<8x32xf32> -> vector<8x32xf32>
    %c0_3 = arith.constant 0 : index
    %c0_4 = arith.constant 0 : index
    %3 = vector.load %arg2[%c0_3, %c0_4] : memref<8x3xf32, #tpu.memory_space<vmem>>, vector<8x3xf32>
    %c0_5 = arith.constant 0 : index
    %c0_6 = arith.constant 0 : index
    %4 = vector.load %arg5[%c0_5, %c0_6] : memref<3x32xf32, #tpu.memory_space<vmem>>, vector<3x32xf32>
    %cst_7 = arith.constant dense<0.000000e+00> : vector<8x32xf32>
    %5 = tpu.matmul %3, %4, %cst_7 {dimension_numbers = #tpu.dot_dimension_numbers<[1], [0], [0], [1], [0, 0, 1, 1], [], []>} : vector<8x3xf32>, vector<3x32xf32>, vector<8x32xf32> -> vector<8x32xf32>
    %6 = arith.addf %2, %5 : vector<8x32xf32>
    %c0_8 = arith.constant 0 : index
    %c0_9 = arith.constant 0 : index
    %7 = vector.load %arg3[%c0_8, %c0_9] : memref<8x2xf32, #tpu.memory_space<vmem>>, vector<8x2xf32>
    %c0_10 = arith.constant 0 : index
    %c0_11 = arith.constant 0 : index
    %8 = vector.load %arg6[%c0_10, %c0_11] : memref<2x32xf32, #tpu.memory_space<vmem>>, vector<2x32xf32>
    %cst_12 = arith.constant dense<0.000000e+00> : vector<8x32xf32>
    %9 = tpu.matmul %7, %8, %cst_12 {dimension_numbers = #tpu.dot_dimension_numbers<[1], [0], [0], [1], [0, 0, 1, 1], [], []>} : vector<8x2xf32>, vector<2x32xf32>, vector<8x32xf32> -> vector<8x32xf32>
    %10 = arith.addf %6, %9 : vector<8x32xf32>
    %c0_13 = arith.constant 0 : index
    %c0_14 = arith.constant 0 : index
    %11 = vector.load %arg7[%c0_13, %c0_14] : memref<1x32xf32, #tpu.memory_space<vmem>>, vector<1x32xf32>
    %12 = vector.broadcast %11 : vector<1x32xf32> to vector<8x32xf32>
    %13 = arith.addf %10, %12 : vector<8x32xf32>
    %cst_15 = arith.constant dense<0.000000e+00> : vector<8xf32>
    %14 = vector.multi_reduction <add>, %13, %cst_15 [1] : vector<8x32xf32> to vector<8xf32>
    %15 = vector.shape_cast %14 : vector<8xf32> to vector<8x1xf32>
    %cst_16 = arith.constant 3.200000e+01 : f32
    %16 = vector.broadcast %cst_16 : f32 to vector<8x1xf32>
    %17 = arith.divf %15, %16 : vector<8x1xf32>
    %18 = vector.broadcast %17 : vector<8x1xf32> to vector<8x32xf32>
    %19 = arith.subf %13, %18 : vector<8x32xf32>
    %20 = arith.mulf %19, %19 : vector<8x32xf32>
    %cst_17 = arith.constant dense<0.000000e+00> : vector<8xf32>
    %21 = vector.multi_reduction <add>, %20, %cst_17 [1] : vector<8x32xf32> to vector<8xf32>
    %22 = vector.shape_cast %21 : vector<8xf32> to vector<8x1xf32>
    %cst_18 = arith.constant 3.200000e+01 : f32
    %23 = vector.broadcast %cst_18 : f32 to vector<8x1xf32>
    %24 = arith.divf %22, %23 : vector<8x1xf32>
    %cst_19 = arith.constant 9.99999974E-6 : f32
    %25 = vector.broadcast %cst_19 : f32 to vector<8x1xf32>
    %26 = arith.addf %24, %25 : vector<8x1xf32>
    %27 = math.rsqrt %26 : vector<8x1xf32>
    %28 = vector.broadcast %27 : vector<8x1xf32> to vector<8x32xf32>
    %29 = arith.mulf %19, %28 : vector<8x32xf32>
    %c0_20 = arith.constant 0 : index
    %c0_21 = arith.constant 0 : index
    %30 = vector.load %arg8[%c0_20, %c0_21] : memref<1x32xf32, #tpu.memory_space<vmem>>, vector<1x32xf32>
    %31 = vector.broadcast %30 : vector<1x32xf32> to vector<8x32xf32>
    %32 = arith.mulf %29, %31 : vector<8x32xf32>
    %c0_22 = arith.constant 0 : index
    %c0_23 = arith.constant 0 : index
    %33 = vector.load %arg9[%c0_22, %c0_23] : memref<1x32xf32, #tpu.memory_space<vmem>>, vector<1x32xf32>
    %34 = vector.broadcast %33 : vector<1x32xf32> to vector<8x32xf32>
    %35 = arith.addf %32, %34 : vector<8x32xf32>
    %cst_24 = arith.constant 0.000000e+00 : f32
    %36 = vector.broadcast %cst_24 : f32 to vector<8x32xf32>
    %37 = arith.maximumf %35, %36 : vector<8x32xf32>
    %c0_25 = arith.constant 0 : index
    %c0_26 = arith.constant 0 : index
    %38 = vector.load %arg10[%c0_25, %c0_26] : memref<1x32xf32, #tpu.memory_space<vmem>>, vector<1x32xf32>
    %39 = vector.broadcast %38 : vector<1x32xf32> to vector<8x32xf32>
    %40 = arith.mulf %37, %39 : vector<8x32xf32>
    %cst_27 = arith.constant dense<0.000000e+00> : vector<8xf32>
    %41 = vector.multi_reduction <add>, %40, %cst_27 [1] : vector<8x32xf32> to vector<8xf32>
    %42 = vector.shape_cast %41 : vector<8xf32> to vector<8x1xf32>
    %c0_28 = arith.constant 0 : index
    %c0_29 = arith.constant 0 : index
    %43 = vector.load %arg11[%c0_28, %c0_29] : memref<1x1xf32, #tpu.memory_space<vmem>>, vector<1x1xf32>
    %44 = vector.broadcast %43 : vector<1x1xf32> to vector<8x1xf32>
    %45 = arith.addf %42, %44 : vector<8x1xf32>
    %c0_30 = arith.constant 0 : index
    %c0_31 = arith.constant 0 : index
    %46 = vector.load %arg12[%c0_30, %c0_31] : memref<8x1xf32, #tpu.memory_space<vmem>>, vector<8x1xf32>
    tpu.vector_store %arg12[%c0_30, %c0_31], %45 {strides = array<i32>} : memref<8x1xf32, #tpu.memory_space<vmem>>, vector<8x1xf32>,
    return
  }
  func.func @transform_0(%arg0: i32) -> (i32, i32) {
    %c0_i32 = arith.constant 0 : i32
    %c0_i32_0 = arith.constant 0 : i32
    return %arg0, %c0_i32 : i32, i32
  }
  func.func @transform_1(%arg0: i32) -> (i32, i32) {
    %c0_i32 = arith.constant 0 : i32
    %c0_i32_0 = arith.constant 0 : i32
    return %arg0, %c0_i32 : i32, i32
  }
  func.func @transform_2(%arg0: i32) -> (i32, i32) {
    %c0_i32 = arith.constant 0 : i32
    %c0_i32_0 = arith.constant 0 : i32
    return %arg0, %c0_i32 : i32, i32
  }
  func.func @transform_3(%arg0: i32) -> (i32, i32) {
    %c0_i32 = arith.constant 0 : i32
    %c0_i32_0 = arith.constant 0 : i32
    %c0_i32_1 = arith.constant 0 : i32
    return %c0_i32, %c0_i32_0 : i32, i32
  }
  func.func @transform_4(%arg0: i32) -> (i32, i32) {
    %c0_i32 = arith.constant 0 : i32
    %c0_i32_0 = arith.constant 0 : i32
    %c0_i32_1 = arith.constant 0 : i32
    return %c0_i32, %c0_i32_0 : i32, i32
  }
  func.func @transform_5(%arg0: i32) -> (i32, i32) {
    %c0_i32 = arith.constant 0 : i32
    %c0_i32_0 = arith.constant 0 : i32
    %c0_i32_1 = arith.constant 0 : i32
    return %c0_i32, %c0_i32_0 : i32, i32
  }
  func.func @transform_6(%arg0: i32) -> (i32, i32) {
    %c0_i32 = arith.constant 0 : i32
    %c0_i32_0 = arith.constant 0 : i32
    %c0_i32_1 = arith.constant 0 : i32
    return %c0_i32, %c0_i32_0 : i32, i32
  }
  func.func @transform_7(%arg0: i32) -> (i32, i32) {
    %c0_i32 = arith.constant 0 : i32
    %c0_i32_0 = arith.constant 0 : i32
    %c0_i32_1 = arith.constant 0 : i32
    return %c0_i32, %c0_i32_0 : i32, i32
  }
  func.func @transform_8(%arg0: i32) -> (i32, i32) {
    %c0_i32 = arith.constant 0 : i32
    %c0_i32_0 = arith.constant 0 : i32
    %c0_i32_1 = arith.constant 0 : i32
    return %c0_i32, %c0_i32_0 : i32, i32
  }
  func.func @transform_9(%arg0: i32) -> (i32, i32) {
    %c0_i32 = arith.constant 0 : i32
    %c0_i32_0 = arith.constant 0 : i32
    %c0_i32_1 = arith.constant 0 : i32
    return %c0_i32, %c0_i32_0 : i32, i32
  }
  func.func @transform_10(%arg0: i32) -> (i32, i32) {
    %c0_i32 = arith.constant 0 : i32
    %c0_i32_0 = arith.constant 0 : i32
    %c0_i32_1 = arith.constant 0 : i32
    return %c0_i32, %c0_i32_0 : i32, i32
  }
  func.func @transform_11(%arg0: i32) -> (i32, i32) {
    %c0_i32 = arith.constant 0 : i32
    %c0_i32_0 = arith.constant 0 : i32
    return %arg0, %c0_i32 : i32, i32
  }
}

</mosaic_0001>

<bundles_post_ra>
// kernel: critic_forward.1
= control target key start
LH: loop header
LB: loop body
LE: loop exit
PB: predicated region body
PF: predicated region fallthrough
CT: control target
= control target key end

     0   :  { %s597_s0 = inlined_call_operand.vmem [shape: f32[8,12], index: 0, kind: input, shape index: {}]   ;;  %s598_s1 = inlined_call_operand.vmem [shape: f32[8,3], index: 1, kind: input, shape index: {}]   ;;  %s599_s2 = inlined_call_operand.vmem [shape: f32[8,2], index: 2, kind: input, shape index: {}]   ;;  %s600_s3 = inlined_call_operand.vmem [shape: f32[12,32], index: 3, kind: input, shape index: {}]   ;;  %s601_s4 = inlined_call_operand.vmem [shape: f32[3,32], index: 4, kind: input, shape index: {}]   ;;  %s602_s5 = inlined_call_operand.vmem [shape: f32[2,32], index: 5, kind: input, shape index: {}]   ;;  %s603_s6 = inlined_call_operand.vmem [shape: f32[1,32], index: 6, kind: input, shape index: {}]   ;;  %s604_s7 = inlined_call_operand.hbm [shape: f32[1,32], index: 7, kind: input, shape index: {}]   ;;  %s605_s8 = inlined_call_operand.hbm [shape: f32[1,32], index: 8, kind: input, shape index: {}]   ;;  %s606_s9 = inlined_call_operand.vmem [shape: f32[1,32], index: 9, kind: input, shape index: {}]   ;;  %s607_s10 = inlined_call_operand.<no memory space> [shape: f32[1,1], index: 10, kind: input, shape index: {}]   ;;  %s608_s11 = inlined_call_operand.vmem [shape: f32[8,1], index: 11, kind: output, shape index: {}]  }
   0x1   :  { %v16_v0 = vstv %s607_s10 }
   0x2   :  { %17 = vst [vmem:[#allocation2] sm:$0x1] %v16_v0 }
   0x3   :  { %18 = vsyncpa [#allocation4], 0 }
   0x4   :  { %19 = vsyncpa [#allocation6], 0  ;;  %s468_s19 = smov [#allocation3]   ;;  %s469_s21 = smov [#allocation5]  }
   0x5   :  { %s40_s20 = sshll.u32 %s468_s19, 4  ;;  %s50_s22 = sshll.u32 %s469_s21, 4  ;;  %s41_s20 = int_to_ptr.vmem [resolvable:$true] %s40_s20  ;;  %s51_s22 = int_to_ptr.vmem [resolvable:$true] %s50_s22 }
   0x6   :  { %s420_s25 = scalar_lea.hbm %s604_s7, 16 }
   0x7   :  { %p421_p0 = scmp.ne.s32.totalorder %s604_s7, %s420_s25  ;;  %p424_p1 = scmp.lt.u32.totalorder %s420_s25, %s604_s7 }
   0x9   :  { %p426_p2 = pnand %p424_p1, %p421_p0 }
   0xb   :  { %429 = shalt.err (!%p426_p2)
}
   0xc   :  { %s430_s10 = scalar_lea.vmem %s41_s20, 16  ;;  %s434_s30 = scalar_lea.vmem %s41_s20, 32 }
   0xd   :  { %p431_p3 = scmp.ne.s32.totalorder %s41_s20, %s430_s10  ;;  %p435_p4 = scmp.lt.s32.totalorder %s41_s20, %s41_s20 }
   0xe   :  { %p436_p5 = scmp.lt.s32.totalorder %s434_s30, %s430_s10 }
  0x10   :  { %p437_p6 = por %p436_p5, %p435_p4 }
  0x12   :  { %p438_p7 = pnand %p437_p6, %p431_p3 }
  0x14   :  { %441 = shalt.err (!%p438_p7)
}
  0x15   :  { %43 = dma.hbm_to_vmem [thread:$0]  %s604_s7, 16, %s41_s20, [#allocation4]  }
  0x16   :  { %s442_s16 = scalar_lea.hbm %s605_s8, 16 }
  0x17   :  { %p443_p8 = scmp.ne.s32.totalorder %s605_s8, %s442_s16  ;;  %p446_p9 = scmp.lt.u32.totalorder %s442_s16, %s605_s8 }
  0x19   :  { %p448_p10 = pnand %p446_p9, %p443_p8 }
  0x1b   :  { %451 = shalt.err (!%p448_p10)
}
  0x1c   :  { %s452_s23 = scalar_lea.vmem %s51_s22, 16  ;;  %s456_s24 = scalar_lea.vmem %s51_s22, 32 }
  0x1d   :  { %p453_p11 = scmp.ne.s32.totalorder %s51_s22, %s452_s23  ;;  %p457_p12 = scmp.lt.s32.totalorder %s51_s22, %s51_s22 }
  0x1e   :  { %p458_p13 = scmp.lt.s32.totalorder %s456_s24, %s452_s23 }
  0x20   :  { %p459_p0 = por %p458_p13, %p457_p12 }
  0x22   :  { %p460_p1 = pnand %p459_p0, %p453_p11 }
  0x24   :  { %463 = shalt.err (!%p460_p1)
}
  0x25   :  { %53 = dma.hbm_to_vmem [thread:$0]  %s605_s8, 16, %s51_s22, [#allocation6]  }
  0x26   :  { %464 = dma.done.wait [#allocation4], 16  }
  0x27   :  { %465 = vsyncadd [#allocation4], 4294967280 }
  0x28   :  { %466 = dma.done.wait [#allocation6], 16  }
  0x29   :  { %467 = vsyncadd [#allocation6], 4294967280  ;;  %v470_v1 = vmov 0.0   ;;  %vm471_vm0 = vmmov 0   ;;  %v472_v2 = vmov 0.0|0.0   ;;  %vm73_vm1 = vcmask 1042432  }
  0x2a   :  { %391 = vmatprep.subr.mxu0 %v470_v1  ;;  %393 = vmatprep.mubr.msk.f32.mxu0 %vm471_vm0, %v470_v1  ;;  %vm151_vm2 = vcmask 1043456   ;;  %vm69_vm3 = vcmask 23552   ;;  %v68_v3 = vld [vmem:[%s601_s4] sm:$0x7]  ;;  %vm231_vm4 = vcmask 1041408   ;;  %vm473_vm5 = vmmov 1  }
  0x2b   :  { %408 = vmatprep.subr.bf16.mxu1 %v472_v2  ;;  %400 = vmatprep.mubr.msk.f32.mxu1 %vm471_vm0, %v470_v1  ;;  %v67_v4 = vld [vmem:[%s598_s1] sm:$0xff]  ;;  %v66_v6 = vld [vmem:[%s600_s3 + $0x8] sm:$0xf]  ;;  %vm410_vm6 = vmpackc.low %vm151_vm2, %vm473_vm5  ;;  %vm227_vm7 = vcmask 15360   ;;  %vm147_vm8 = vcmask 97280   ;;  %vm314_vm9 = vcmask 261120  }
  0x2c   :  { %v65_v5 = vld [vmem:[%s600_s3] sm:$0xff]  ;;  %392 = vmatpush3.msk.msra.mxu0 %vm73_vm1, %v68_v3  ;;  %vm365_vm10 = vcmask 7168  }
  0x2d   :  { %v226_v7 = vld [vmem:[%s602_s5] sm:$0x3]  ;;  %394 = vmatmul.mubr.msk.f32.vlgmr.msra.gmra.mrb[0].mxu0 %vm69_vm3, %v67_v4  ;;  %v409_v8 = vpack.c.bf16 %v66_v6, %v65_v5  ;;  %403 = vmatprep.subr.mxu0 %v470_v1  ;;  %v381_v33 = vld [vmem:[#allocation5] ss:$0 sm:$0xff] }
  0x2e   :  { %404 = vmatpush3.msk.msra.mxu0 %vm231_vm4, %v226_v7  ;;  %405 = vmatprep.mubr.msk.f32.mxu0 %vm471_vm0, %v470_v1  ;;  %v225_v9 = vld [vmem:[%s599_s2] sm:$0xff] }
  0x2f   :  { %411 = vmatpush3.bf16.msk.msra.mxu1 %vm410_vm6, %v409_v8  ;;  %v64_v10 = vld [vmem:[%s597_s0] sm:$0xff] }
  0x30   :  { %v379_v18 = vld [vmem:[%s603_s6] ss:$0 sm:$0xff]  ;;  %v380_v31 = vld [vmem:[#allocation3] ss:$0 sm:$0xff] }
  0x31   :  { %406 = vmatmul.mubr.msk.f32.vlgmr.msra.gmra.mrb[2].mxu0 %vm227_vm7, %v225_v9  ;;  %v382_v36 = vld [vmem:[%s606_s9] ss:$0 sm:$0xff] }
  0x32   :  { %401 = vmatmul.mubr.msk.f32.vlgmr.msra.gmra.mrb[0].mxu1 %vm147_vm8, %v64_v10  ;;  %v383_v40 = vld [vmem:[#allocation2] ss:$0 sm:$0xff] }
 0x100   :  { %v143_v11 = vpop.f32.mrb[0].mxu0 }
 0x101   :  { %v395_v12 = vpop.f32.mrb[1].mxu0 }
 0x104   :  { %v301_v13 = vpop.f32.mrb[2].mxu0 }
 0x105   :  { %v221_v14 = vpop.f32.mrb[0].mxu1  ;;  %v407_v15 = vpop.f32.mrb[3].mxu0 }
 0x106   :  { %v222_v16 = vadd.f32 %v221_v14, %v143_v11  ;;  %v402_v17 = vpop.f32.mrb[1].mxu1 }
 0x108   :  { %v305_v19 = vadd.f32 %v301_v13, %v222_v16 }
 0x10a   :  { %v313_v20 = vadd.f32 %v379_v18, %v305_v19 }
 0x10c   :  { %v315_v21 = vsel %vm314_vm9, %v313_v20, 0.0 }
 0x10d   :  { %316 = vadd.xlane.f32.xlu0 %v315_v21 }
 0x19a   :  { %v317_v22 = vpop.xlane.xlu0 %316 }
 0x19b   :  { %v319_v23 = vmul.f32 0.03125, %v317_v22 }
 0x19d   :  { %v320_v24 = vsub.f32 %v313_v20, %v319_v23 }
 0x19f   :  { %v321_v25 = vmul.f32 %v320_v24, %v320_v24 }
 0x1a1   :  { %v322_v26 = vsel %vm314_vm9, %v321_v25, 0.0 }
 0x1a2   :  { %323 = vadd.xlane.f32.xlu0 %v322_v26 }
 0x22f   :  { %v324_v27 = vpop.xlane.xlu0 %323 }
 0x230   :  { %v325_v28 = vmul.f32 0.03125, %v324_v27 }
 0x232   :  { %v326_v29 = vadd.f32 1e-05, %v325_v28 }
 0x234   :  { %418 = vrsqrt.f32 %v326_v29 }
 0x23e   :  { %v419_v30 = vpop.eup %418 }
 0x23f   :  { %v328_v32 = vmul.f32 %v419_v30, %v320_v24 }
 0x241   :  { %v336_v34 = vmul.f32 %v380_v31, %v328_v32 }
 0x243   :  { %v344_v35 = vadd.f32 %v381_v33, %v336_v34 }
 0x245   :  { %v345_v37 = vmax.f32 %v344_v35, 0.0 }
 0x247   :  { %v353_v38 = vmul.f32 %v382_v36, %v345_v37 }
 0x249   :  { %v354_v39 = vsel %vm314_vm9, %v353_v38, 0.0 }
 0x24a   :  { %355 = vadd.xlane.f32.xlu1 %v354_v39 }
 0x2d7   :  { %v356_v41 = vpop.xlane.xlu1 %355 }
 0x2d8   :  { %v364_v42 = vadd.f32 %v383_v40, %v356_v41 }
 0x2da   :  { %366 = vst.msk [vmem:[%s608_s11] sm:$0xff] %vm365_vm10, %v364_v42 }
 0x2db   :  { %371 = vsyncpa [#allocation4], 1 }
 0x2dc   :  { %372 = vsyncpa [#allocation6], 1 }

</bundles_post_ra>
